<compile_context>
chip_gen: v7x
topology: tpu7x:2x2x1
jax: 0.10.0
libtpu: 0.0.40
codegen_flags: <defaults>
</compile_context>

<pallas_src>
import functools
import math

import jax
import jax.numpy as jnp
from jax.experimental import pallas as pl
from jax.experimental.pallas import tpu as pltpu


def _round_up(x, m):
    return -(-x // m) * m


def _padded_channels(C, W):
    """Smallest Cp >= C such that W*Cp is a multiple of 128 (lane-dense)."""
    step = 128 // math.gcd(W, 128)
    Cp = _round_up(C, step)
    if Cp > 4 * max(C, 8):          # avoid pathological inflation for odd W
        Cp = _round_up(C, 8)
    return Cp


def _band_matrix(w, W, Cp):
    """(Cout, Cin, k, k) conv weights -> (k*W*Cp, W*Cp) banded matrix.

    Row index  = dy*(W*Cp) + xin*Cp + ci   (matches a lane-concat of the k
    row-shifted, channels-last flattened activation windows).
    Col index  = xout*Cp + co.
    Entry      = w[co, ci, dy, xin - xout + pad] when 0 <= xin-xout+pad < k,
    else 0 (which also realizes the W zero-padding).  One MXU matmul against
    this band applies all k*k taps and the Cin->Cout mixing at once.
    """
    Cout, Cin, k, _ = w.shape
    pad = k // 2
    wp = jnp.zeros((Cp, Cp, k, k), w.dtype).at[:Cout, :Cin].set(w)
    xin = jnp.arange(W)[:, None]                   # (W, 1) input x position
    xout = jnp.arange(W)[None, :]                  # (1, W) output x position
    dx = xin - xout + pad                          # (W, W) horizontal tap idx
    valid = (dx >= 0) & (dx < k)
    dx_c = jnp.clip(dx, 0, k - 1)
    wt = jnp.transpose(wp, (2, 3, 1, 0))           # (k_dy, k_dx, Cin, Cout)
    band = wt[:, dx_c, :, :]                       # (k, W_in, W_out, Cin, Cout)
    band = band * valid[None, :, :, None, None].astype(w.dtype)
    band = jnp.transpose(band, (0, 1, 3, 2, 4))    # (k, W_in, Cin, W_out, Cout)
    return band.reshape(k * W * Cp, W * Cp)


def make_resblock_params(w1, b1, w2, b2, res_scale, W, *,
                         band_dtype=jnp.float32):
    """Build banded weights / tiled biases once per weight set.

    res_scale is folded into the conv2 band and bias.  band_dtype=bfloat16 is
    the v6e/v7x lever (bf16-native MXU, half the band DMA/VMEM).
    """
    C = w1.shape[0]
    Cp = _padded_channels(C, W)
    rs = jnp.asarray(res_scale, jnp.float32)
    a1 = _band_matrix(w1, W, Cp).astype(band_dtype)
    a2 = (_band_matrix(w2, W, Cp) * rs).astype(band_dtype)
    b1p = jnp.pad(b1, (0, Cp - C))
    b2p = jnp.pad(b2, (0, Cp - C)) * rs
    b1r = jnp.tile(b1p, W).reshape(1, W * Cp).astype(jnp.float32)
    b2r = jnp.tile(b2p, W).reshape(1, W * Cp).astype(jnp.float32)
    return a1, b1r, a2, b2r


def resblock_kernel(x_ref, a1_ref, b1_ref, a2_ref, b2_ref, o_ref, *,
                    R, pad, H, k, win):
    # x_ref:  (1, Hp, WC)          whole H-padded image (lane dim = W*Cp)
    # a*_ref: (k*WC, WC)           banded conv weights (vertical taps in K dim)
    # b*_ref: (1, WC)              per-(x, c) tiled biases (res_scale folded)
    # o_ref:  (1, R, WC)           this row block of the output
    r = pl.program_id(1)
    row0 = pl.multiple_of(r * R, R)       # top of this block's input window
    halo = win - 2 * pad                  # mid rows computed this step

    # Single load of the haloed input window; dy shifts are register slices.
    xwin = x_ref[0, pl.ds(row0, win), :]  # (win, WC)
    wdt = a1_ref.dtype

    # ---- conv1 + bias + ReLU: one MXU dot with K = k*WC --------------------
    lhs1 = jnp.concatenate([xwin[dy:dy + halo, :] for dy in range(k)], axis=1)
    acc1 = jnp.dot(lhs1.astype(wdt), a1_ref[...],
                   preferred_element_type=jnp.float32)
    acc1 += b1_ref[...]

    # Mid rows outside the true image act as conv2's zero H-padding.
    rid = jax.lax.broadcasted_iota(jnp.int32, (halo, 1), 0)
    g = row0 - pad + rid                  # global mid-row index
    mid = jnp.where((g >= 0) & (g < H), jnp.maximum(acc1, 0.0), 0.0)

    # ---- conv2 + bias (res_scale pre-folded): one MXU dot ------------------
    lhs2 = jnp.concatenate([mid[dy:dy + R, :] for dy in range(k)], axis=1)
    acc2 = jnp.dot(lhs2.astype(wdt), a2_ref[...],
                   preferred_element_type=jnp.float32)
    acc2 += b2_ref[...]

    # ---- residual add; lane-dense store (WC is a multiple of 128) ----------
    x_center = xwin[2 * pad:2 * pad + R, :]
    o_ref[0] = (acc2 + x_center.astype(jnp.float32)).astype(o_ref.dtype)


def resblock_forward(x_nchw, a1, b1r, a2, b2r, *, row_block=128):
    """x_nchw: (N, C, H, W) float32. a*/b* from make_resblock_params."""
    N, C, H, W = x_nchw.shape
    WCp = a1.shape[1]
    Cp = WCp // W
    k = a1.shape[0] // WCp
    pad = k // 2

    # --- row tiling: large sublane-aligned blocks so the MXU M-dim fills ----
    rb = max(8, (row_block // 8) * 8)
    if H <= rb:
        R, nR = H, 1
    else:
        R = rb
        nR = pl.cdiv(H, R)
    Hr = nR * R
    win = _round_up(R + 4 * pad, 8)       # input rows read per step (aligned)
    Hp = Hr - R + win                     # padded-H extent (>= Hr + 4*pad)

    # --- layout plumbing: one fused transpose + pad pass ---------------------
    # NCHW -> (N, Hp, W*Cp) channels-last flattened: 2*pad zero rows on top,
    # the rest at the bottom, channels zero-padded C -> Cp.  No W padding
    # (folded into the bands).
    xt = jnp.transpose(x_nchw, (0, 2, 3, 1))
    xt = jnp.pad(xt, ((0, 0), (2 * pad, Hp - H - 2 * pad), (0, 0), (0, Cp - C)))
    xp = xt.reshape(N, Hp, WCp)

    kernel = functools.partial(resblock_kernel, R=R, pad=pad, H=H, k=k, win=win)

    # VMEM budget: double-buffered image block, bands, output, temporaries.
    # Capped at 48 MiB so it stays safe on v7x's 64 MiB physical VMEM.
    est = (2 * Hp * WCp * 4
           + 2 * (a1.size * a1.dtype.itemsize + a2.size * a2.dtype.itemsize)
           + 4 * R * WCp * 4
           + 6 * win * k * WCp * 4)
    vmem_bytes = int(min(48 * 1024 * 1024, max(16 * 1024 * 1024, 2 * est)))

    out = pl.pallas_call(
        kernel,
        out_shape=jax.ShapeDtypeStruct((N, Hr, WCp), x_nchw.dtype),
        grid_spec=pltpu.PrefetchScalarGridSpec(
            num_scalar_prefetch=0,
            grid=(N, nR),
            in_specs=[
                # Padded image: constant block index along the row axis ->
                # DMA'd once per batch element, VMEM-resident across r.
                pl.BlockSpec((1, Hp, WCp), lambda n, r: (n, 0, 0)),
                # Banded weights / biases: constant index maps -> fetched once.
                # (On v7x, pipeline_mode=pl.Buffered(1) on these invariant
                #  operands would halve their resident footprint.)
                pl.BlockSpec((k * WCp, WCp), lambda n, r: (0, 0)),
                pl.BlockSpec((1, WCp), lambda n, r: (0, 0)),
                pl.BlockSpec((k * WCp, WCp), lambda n, r: (0, 0)),
                pl.BlockSpec((1, WCp), lambda n, r: (0, 0)),
            ],
            out_specs=pl.BlockSpec((1, R, WCp), lambda n, r: (n, r, 0)),
        ),
        compiler_params=pltpu.CompilerParams(
            dimension_semantics=("parallel", "parallel"),
            vmem_limit_bytes=vmem_bytes),
    )(xp, a1, b1r, a2, b2r)

    out = out[:, :H, :].reshape(N, H, W, Cp)[..., :C]     # drop row/chan pad
    return jnp.transpose(out, (0, 3, 1, 2))               # back to NCHW


def resblock_reference(x, w1, b1, w2, b2, res_scale=1.0):
    """Pure-JAX reference (NCHW), matches PyTorch Conv2d with padding=k//2."""
    dn = ("NCHW", "OIHW", "NCHW")
    pad = w1.shape[-1] // 2
    hp = jax.lax.Precision.HIGHEST
    y = jax.lax.conv_general_dilated(x, w1, (1, 1), [(pad, pad), (pad, pad)],
                                     dimension_numbers=dn, precision=hp)
    y = jnp.maximum(y + b1[None, :, None, None], 0.0)
    y = jax.lax.conv_general_dilated(y, w2, (1, 1), [(pad, pad), (pad, pad)],
                                     dimension_numbers=dn, precision=hp)
    y = y + b2[None, :, None, None]
    return y * res_scale + x


if __name__ == "__main__":
    # Small shapes consistent with the module: batch=2, n_feat=4, 16x16, k=3.
    N, C, H, W, k = 2, 4, 16, 16, 3
    key = jax.random.PRNGKey(0)
    kx, k1, k2, k3, k4 = jax.random.split(key, 5)

    x = jax.random.normal(kx, (N, C, H, W), jnp.float32)
    w1 = jax.random.normal(k1, (C, C, k, k), jnp.float32) * 0.1
    b1 = jax.random.normal(k2, (C,), jnp.float32) * 0.1
    w2 = jax.random.normal(k3, (C, C, k, k), jnp.float32) * 0.1
    b2 = jax.random.normal(k4, (C,), jnp.float32) * 0.1
    res_scale = 1.0

    # Bands / biases built once per weight set (hoisted out of the forward).
    # band_dtype=jnp.bfloat16 is the v6e/v7x lever; f32 here to stay within
    # the 2e-3 tolerance of the HIGHEST-precision reference.
    a1, b1r, a2, b2r = jax.block_until_ready(
        make_resblock_params(w1, b1, w2, b2, res_scale, W,
                             band_dtype=jnp.float32))

    fwd = jax.jit(resblock_forward)
    out = jax.block_until_ready(fwd(x, a1, b1r, a2, b2r))
    ref = resblock_reference(x, w1, b1, w2, b2, res_scale)

    if not jnp.allclose(out, ref, atol=2e-3, rtol=2e-3):
        diff = float(jnp.max(jnp.abs(out - ref)))
        raise AssertionError(
            f"Pallas ResBlock mismatch vs JAX reference, max|diff|={diff}")

    print("KERNEL_OK")
</pallas_src>

<mosaic_0001>
module attributes {stable_mosaic.version = 11 : i64} {
  func.func @resblock_kernel(%arg0: i32, %arg1: i32, %arg2: memref<1x24x128xf32, #tpu.memory_space<vmem>>, %arg3: memref<384x128xf32, #tpu.memory_space<vmem>>, %arg4: memref<1x128xf32, #tpu.memory_space<vmem>>, %arg5: memref<384x128xf32, #tpu.memory_space<vmem>>, %arg6: memref<1x128xf32, #tpu.memory_space<vmem>>, %arg7: memref<1x16x128xf32, #tpu.memory_space<vmem>>) attributes {dimension_semantics = [#tpu.dimension_semantics<parallel>, #tpu.dimension_semantics<parallel>], iteration_bounds = array<i64: 2, 1>, scalar_prefetch = 0 : i64, scratch_operands = 0 : i64, tpu.core_type = #tpu.core_type<tc>, window_params = [{transform_indices = @transform_0, window_bounds = array<i64: 1, 24, 128>}, {pipeline_mode = #tpu.pipeline_mode<synchronous>, transform_indices = @transform_1, window_bounds = array<i64: 384, 128>}, {pipeline_mode = #tpu.pipeline_mode<synchronous>, transform_indices = @transform_2, window_bounds = array<i64: 1, 128>}, {pipeline_mode = #tpu.pipeline_mode<synchronous>, transform_indices = @transform_3, window_bounds = array<i64: 384, 128>}, {pipeline_mode = #tpu.pipeline_mode<synchronous>, transform_indices = @transform_4, window_bounds = array<i64: 1, 128>}, {transform_indices = @transform_5, window_bounds = array<i64: 1, 16, 128>}]} {
    %c16_i32 = arith.constant 16 : i32
    %0 = arith.muli %arg1, %c16_i32 : i32
    %1 = tpu.assume_multiple %0, 16 : i32
    %c0 = arith.constant 0 : index
    %2 = arith.index_cast %1 : i32 to index
    %c0_0 = arith.constant 0 : index
    %3 = vector.load %arg2[%c0, %2, %c0_0] : memref<1x24x128xf32, #tpu.memory_space<vmem>>, vector<1x24x128xf32>
    %4 = vector.shape_cast %3 : vector<1x24x128xf32> to vector<24x128xf32>
    %5 = vector.extract_strided_slice %4 {offsets = [0, 0], sizes = [22, 128], strides = [1, 1]} : vector<24x128xf32> to vector<22x128xf32>
    %6 = vector.extract_strided_slice %4 {offsets = [1, 0], sizes = [22, 128], strides = [1, 1]} : vector<24x128xf32> to vector<22x128xf32>
    %7 = vector.extract_strided_slice %4 {offsets = [2, 0], sizes = [22, 128], strides = [1, 1]} : vector<24x128xf32> to vector<22x128xf32>
    %8 = tpu.concatenate %5, %6, %7 in 1 : vector<22x128xf32>, vector<22x128xf32>, vector<22x128xf32> -> vector<22x384xf32>
    %c0_1 = arith.constant 0 : index
    %c0_2 = arith.constant 0 : index
    %9 = vector.load %arg3[%c0_1, %c0_2] : memref<384x128xf32, #tpu.memory_space<vmem>>, vector<384x128xf32>
    %cst = arith.constant dense<0.000000e+00> : vector<22x128xf32>
    %10 = tpu.matmul %8, %9, %cst {dimension_numbers = #tpu.dot_dimension_numbers<[1], [0], [0], [1], [0, 0, 1, 1], [], []>} : vector<22x384xf32>, vector<384x128xf32>, vector<22x128xf32> -> vector<22x128xf32>
    %c0_3 = arith.constant 0 : index
    %c0_4 = arith.constant 0 : index
    %11 = vector.load %arg4[%c0_3, %c0_4] : memref<1x128xf32, #tpu.memory_space<vmem>>, vector<1x128xf32>
    %12 = vector.broadcast %11 : vector<1x128xf32> to vector<22x128xf32>
    %13 = arith.addf %10, %12 : vector<22x128xf32>
    %14 = tpu.iota {dimensions = array<i32: 0>} : vector<22x1xi32>
    %c1_i32 = arith.constant 1 : i32
    %15 = arith.subi %1, %c1_i32 : i32
    %16 = vector.broadcast %15 : i32 to vector<22x1xi32>
    %17 = arith.addi %16, %14 : vector<22x1xi32>
    %c0_i32 = arith.constant 0 : i32
    %18 = vector.broadcast %c0_i32 : i32 to vector<22x1xi32>
    %19 = arith.cmpi sge, %17, %18 : vector<22x1xi32>
    %c16_i32_5 = arith.constant 16 : i32
    %20 = vector.broadcast %c16_i32_5 : i32 to vector<22x1xi32>
    %21 = arith.cmpi slt, %17, %20 : vector<22x1xi32>
    %22 = arith.andi %19, %21 : vector<22x1xi1>
    %cst_6 = arith.constant 0.000000e+00 : f32
    %23 = vector.broadcast %cst_6 : f32 to vector<22x128xf32>
    %24 = arith.maximumf %13, %23 : vector<22x128xf32>
    %cst_7 = arith.constant 0.000000e+00 : f32
    %25 = vector.shape_cast %22 : vector<22x1xi1> to vector<22x1xi1>
    %26 = vector.broadcast %25 : vector<22x1xi1> to vector<22x128xi1>
    %27 = vector.broadcast %cst_7 : f32 to vector<22x128xf32>
    %28 = arith.select %26, %24, %27 : vector<22x128xi1>, vector<22x128xf32>
    %29 = vector.extract_strided_slice %28 {offsets = [0, 0], sizes = [16, 128], strides = [1, 1]} : vector<22x128xf32> to vector<16x128xf32>
    %30 = vector.extract_strided_slice %28 {offsets = [1, 0], sizes = [16, 128], strides = [1, 1]} : vector<22x128xf32> to vector<16x128xf32>
    %31 = vector.extract_strided_slice %28 {offsets = [2, 0], sizes = [16, 128], strides = [1, 1]} : vector<22x128xf32> to vector<16x128xf32>
    %32 = tpu.concatenate %29, %30, %31 in 1 : vector<16x128xf32>, vector<16x128xf32>, vector<16x128xf32> -> vector<16x384xf32>
    %c0_8 = arith.constant 0 : index
    %c0_9 = arith.constant 0 : index
    %33 = vector.load %arg5[%c0_8, %c0_9] : memref<384x128xf32, #tpu.memory_space<vmem>>, vector<384x128xf32>
    %cst_10 = arith.constant dense<0.000000e+00> : vector<16x128xf32>
    %34 = tpu.matmul %32, %33, %cst_10 {dimension_numbers = #tpu.dot_dimension_numbers<[1], [0], [0], [1], [0, 0, 1, 1], [], []>} : vector<16x384xf32>, vector<384x128xf32>, vector<16x128xf32> -> vector<16x128xf32>
    %c0_11 = arith.constant 0 : index
    %c0_12 = arith.constant 0 : index
    %35 = vector.load %arg6[%c0_11, %c0_12] : memref<1x128xf32, #tpu.memory_space<vmem>>, vector<1x128xf32>
    %36 = vector.broadcast %35 : vector<1x128xf32> to vector<16x128xf32>
    %37 = arith.addf %34, %36 : vector<16x128xf32>
    %38 = vector.extract_strided_slice %4 {offsets = [2, 0], sizes = [16, 128], strides = [1, 1]} : vector<24x128xf32> to vector<16x128xf32>
    %39 = arith.addf %37, %38 : vector<16x128xf32>
    %c0_13 = arith.constant 0 : index
    %c0_14 = arith.constant 0 : index
    %c0_15 = arith.constant 0 : index
    %40 = vector.load %arg7[%c0_13, %c0_14, %c0_15] : memref<1x16x128xf32, #tpu.memory_space<vmem>>, vector<1x16x128xf32>
    %41 = vector.shape_cast %40 : vector<1x16x128xf32> to vector<16x128xf32>
    %42 = vector.shape_cast %39 : vector<16x128xf32> to vector<1x16x128xf32>
    tpu.vector_store %arg7[%c0_13, %c0_14, %c0_15], %42 {strides = array<i32>} : memref<1x16x128xf32, #tpu.memory_space<vmem>>, vector<1x16x128xf32>,
    return
  }
  func.func @transform_0(%arg0: i32, %arg1: i32) -> (i32, i32, i32) {
    %c0_i32 = arith.constant 0 : i32
    %c0_i32_0 = arith.constant 0 : i32
    %c0_i32_1 = arith.constant 0 : i32
    return %arg0, %c0_i32, %c0_i32_0 : i32, i32, i32
  }
  func.func @transform_1(%arg0: i32, %arg1: i32) -> (i32, i32) {
    %c0_i32 = arith.constant 0 : i32
    %c0_i32_0 = arith.constant 0 : i32
    %c0_i32_1 = arith.constant 0 : i32
    return %c0_i32, %c0_i32_0 : i32, i32
  }
  func.func @transform_2(%arg0: i32, %arg1: i32) -> (i32, i32) {
    %c0_i32 = arith.constant 0 : i32
    %c0_i32_0 = arith.constant 0 : i32
    %c0_i32_1 = arith.constant 0 : i32
    return %c0_i32, %c0_i32_0 : i32, i32
  }
  func.func @transform_3(%arg0: i32, %arg1: i32) -> (i32, i32) {
    %c0_i32 = arith.constant 0 : i32
    %c0_i32_0 = arith.constant 0 : i32
    %c0_i32_1 = arith.constant 0 : i32
    return %c0_i32, %c0_i32_0 : i32, i32
  }
  func.func @transform_4(%arg0: i32, %arg1: i32) -> (i32, i32) {
    %c0_i32 = arith.constant 0 : i32
    %c0_i32_0 = arith.constant 0 : i32
    %c0_i32_1 = arith.constant 0 : i32
    return %c0_i32, %c0_i32_0 : i32, i32
  }
  func.func @transform_5(%arg0: i32, %arg1: i32) -> (i32, i32, i32) {
    %c0_i32 = arith.constant 0 : i32
    %c0_i32_0 = arith.constant 0 : i32
    return %arg0, %arg1, %c0_i32 : i32, i32, i32
  }
}

</mosaic_0001>

<bundles_post_ra>
// kernel: resblock_forward.1
= control target key start
LH: loop header
LB: loop body
LE: loop exit
PB: predicated region body
PF: predicated region fallthrough
CT: control target
= control target key end

     0   :  { %s1239_s18 = smov 0   ;;  %s1241_s19 = smov 0   ;;  %s1632_s0 = inlined_call_operand.vmem [shape: f32[2,24,128], index: 0, kind: input, shape index: {}]   ;;  %s1633_s1 = inlined_call_operand.vmem [shape: f32[384,128], index: 1, kind: input, shape index: {}]   ;;  %s1634_s2 = inlined_call_operand.vmem [shape: f32[1,128], index: 2, kind: input, shape index: {}]   ;;  %s1635_s3 = inlined_call_operand.vmem [shape: f32[384,128], index: 3, kind: input, shape index: {}]   ;;  %s1636_s4 = inlined_call_operand.vmem [shape: f32[1,128], index: 4, kind: input, shape index: {}]   ;;  %s1637_s5 = inlined_call_operand.vmem [shape: f32[2,16,128], index: 5, kind: output, shape index: {}]  }
   0x1   :  { %s1243_s20 = smov 0  }
   0x2 LB: > { %s27_s21 = sadd.s32 1, %s1200_s19  ;;  %p832_p0 = scmp.ge.s32.totalorder %s1204_s20, 1  ;;  %s1204_s20 = sphi %s1243_s20, %s15_s20   ;;  %s1200_s19 = sphi %s1241_s19, %s1639_s19   ;;  %s1196_s18 = sphi %s1239_s18, %s1638_s18  }
   0x3   : > { %p29_p1 = scmp.ge.s32.totalorder %s27_s21, 2  ;;  %p201_p2 = scmp.lt.s32.totalorder %s1204_s20, 3 }
   0x5   : > { %s1641_s21 = smov (%p29_p1, %s27_s21), 0  ;;  %p202_p3 = pnand %p832_p0, %p201_p2 }
   0x6   : > { %v290_v0 = vld [vmem:[%s1633_s1 + $0x80] sm:$0xff] (!%p202_p3)  ;;  %v291_v1 = vld [vmem:[%s1633_s1 + $0x88] sm:$0xff] (!%p202_p3)  ;;  %p233_p4 = scmp.lt.s32.totalorder (!%p202_p3), %s1196_s18, 1  ;;  %v292_v5 = vld [vmem:[%s1633_s1 + $0x90] sm:$0xff] (!%p202_p3)  ;;  %v1206_v7 = vmov (!%p202_p3), 0.0|0.0   ;;  %vm1207_vm0 = vmmov (!%p202_p3), 0  }
   0x7   : > { %205 = sbr.rel (%p202_p3) target bundleno = 497 (0x1f1), region = 40  ;;  %v274_v2 = vld [vmem:[%s1633_s1] sm:$0xff] (!%p202_p3)  ;;  %v1034_v3 = vpack.c.bf16 (!%p202_p3), %v291_v1, %v290_v0  ;;  %v275_v4 = vld [vmem:[%s1633_s1 + $0x8] sm:$0xff] (!%p202_p3)  ;;  %v293_v6 = vld [vmem:[%s1633_s1 + $0x98] sm:$0xff] (!%p202_p3)  ;;  %1066 = vmatprep.subr.bf16.mxu1 (!%p202_p3), %v1206_v7  ;;  %v1208_v13 = vmov (!%p202_p3), 0.0   ;;  %vm256_vm1 = vcmask (!%p202_p3), 1046528  }
   0x8   : > { %v1036_v8 = vpack.c.bf16 (!%p202_p3), %v275_v4, %v274_v2  ;;  %v1038_v9 = vpack.c.bf16 (!%p202_p3), %v293_v6, %v292_v5  ;;  %v276_v10 = vld [vmem:[%s1633_s1 + $0x10] sm:$0xff] (!%p202_p3)  ;;  %v277_v11 = vld [vmem:[%s1633_s1 + $0x18] sm:$0xff] (!%p202_p3)  ;;  %v306_v12 = vld [vmem:[%s1633_s1 + $0x100] sm:$0xff] (!%p202_p3)  ;;  %990 = vmatprep.mubr.msk.f32.mxu1 (!%p202_p3), %vm1207_vm0, %v1208_v13  ;;  %vm265_vm2 = vcmask (!%p202_p3), 1045504  }
   0x9   : > { %1035 = vmatprep.subr.bf16.mxu0 (!%p202_p3), %v1034_v3  ;;  %v307_v14 = vld [vmem:[%s1633_s1 + $0x108] sm:$0xff] (!%p202_p3)  ;;  %v294_v15 = vld [vmem:[%s1633_s1 + $0xa0] sm:$0xff] (!%p202_p3)  ;;  %v1040_v17 = vpack.c.bf16 (!%p202_p3), %v277_v11, %v276_v10  ;;  %v308_v19 = vld [vmem:[%s1633_s1 + $0x110] sm:$0xff] (!%p202_p3) }
   0xa   : > { %v295_v16 = vld [vmem:[%s1633_s1 + $0xa8] sm:$0xff] (!%p202_p3)  ;;  %1037 = vmatpush3.bf16.msra.mxu0 (!%p202_p3), %v1036_v8  ;;  %v1067_v18 = vpack.c.bf16 (!%p202_p3), %v307_v14, %v306_v12  ;;  %v278_v21 = vld [vmem:[%s1633_s1 + $0x20] sm:$0xff] (!%p202_p3)  ;;  %v309_v23 = vld [vmem:[%s1633_s1 + $0x118] sm:$0xff] (!%p202_p3) }
   0xb   : > { %1039 = vmatprep.subr.bf16.mxu0 (!%p202_p3), %v1038_v9  ;;  %v1042_v20 = vpack.c.bf16 (!%p202_p3), %v295_v16, %v294_v15  ;;  %v279_v22 = vld [vmem:[%s1633_s1 + $0x28] sm:$0xff] (!%p202_p3)  ;;  %v1070_v24 = vpack.c.bf16 (!%p202_p3), %v309_v23, %v308_v19  ;;  %v296_v25 = vld [vmem:[%s1633_s1 + $0xb0] sm:$0xff] (!%p202_p3)  ;;  %v297_v26 = vld [vmem:[%s1633_s1 + $0xb8] sm:$0xff] (!%p202_p3) }
   0xc   : > { %1068 = vmatpush3.bf16.msra.mxu1 (!%p202_p3), %v1067_v18  ;;  %v310_v27 = vld [vmem:[%s1633_s1 + $0x120] sm:$0xff] (!%p202_p3)  ;;  %v311_v28 = vld [vmem:[%s1633_s1 + $0x128] sm:$0xff] (!%p202_p3)  ;;  %v1044_v29 = vpack.c.bf16 (!%p202_p3), %v279_v22, %v278_v21  ;;  %v1046_v30 = vpack.c.bf16 (!%p202_p3), %v297_v26, %v296_v25  ;;  %v280_v31 = vld [vmem:[%s1633_s1 + $0x30] sm:$0xff] (!%p202_p3) }
   0xd   : > { %1069 = vmatprep.subr.bf16.mxu1 (!%p202_p3), %v1206_v7  ;;  %v281_v32 = vld [vmem:[%s1633_s1 + $0x38] sm:$0xff] (!%p202_p3)  ;;  %v1073_v33 = vpack.c.bf16 (!%p202_p3), %v311_v28, %v310_v27  ;;  %v298_v34 = vld [vmem:[%s1633_s1 + $0xc0] sm:$0xff] (!%p202_p3)  ;;  %v299_v35 = vld [vmem:[%s1633_s1 + $0xc8] sm:$0xff] (!%p202_p3) }
   0xe   : > { %s1643_s18 = smov (!%p233_p4, %s1196_s18), 1  ;;  %1041 = vmatpush3.bf16.msra.mxu0 %v1040_v17  ;;  %v312_v36 = vld [vmem:[%s1633_s1 + $0x130] sm:$0xff]  ;;  %v313_v37 = vld [vmem:[%s1633_s1 + $0x138] sm:$0xff]  ;;  %v1048_v38 = vpack.c.bf16 %v281_v32, %v280_v31  ;;  %v1050_v39 = vpack.c.bf16 %v299_v35, %v298_v34  ;;  %v282_v40 = vld [vmem:[%s1633_s1 + $0x40] sm:$0xff] }
   0xf   : > { %s1154_s16 = smul.u32 24, %s1643_s18  ;;  %1043 = vmatprep.subr.bf16.mxu0 %v1042_v20  ;;  %v283_v41 = vld [vmem:[%s1633_s1 + $0x48] sm:$0xff]  ;;  %v1076_v42 = vpack.c.bf16 %v313_v37, %v312_v36  ;;  %v300_v43 = vld [vmem:[%s1633_s1 + $0xd0] sm:$0xff]  ;;  %v301_v44 = vld [vmem:[%s1633_s1 + $0xd8] sm:$0xff]  ;;  %s841_s9 = sshll.u32 %s1643_s18, 4 }
  0x10   : > { %1071 = vmatpush3.bf16.msra.mxu1 %v1070_v24  ;;  %v314_v45 = vld [vmem:[%s1633_s1 + $0x140] sm:$0xff]  ;;  %v315_v46 = vld [vmem:[%s1633_s1 + $0x148] sm:$0xff]  ;;  %v1052_v49 = vpack.c.bf16 %v283_v41, %v282_v40  ;;  %v1054_v52 = vpack.c.bf16 %v301_v44, %v300_v43  ;;  %v284_v53 = vld [vmem:[%s1633_s1 + $0x50] sm:$0xff]  ;;  %s246_s13 = scalar_lea.vmem %s1637_s5, %s841_s9 }
  0x11   : > { %1072 = vmatprep.subr.bf16.mxu1 %v1206_v7  ;;  %s1352_s10 = scalar_lea.vmem %s1632_s0, %s1154_s16  ;;  %v285_v54 = vld [vmem:[%s1633_s1 + $0x58] sm:$0xff]  ;;  %v1079_v55 = vpack.c.bf16 %v315_v46, %v314_v45  ;;  %v302_v56 = vld [vmem:[%s1633_s1 + $0xe0] sm:$0xff]  ;;  %v303_v57 = vld [vmem:[%s1633_s1 + $0xe8] sm:$0xff] }
  0x12   : > { %1045 = vmatpush3.bf16.msra.mxu0 %v1044_v29  ;;  %v1374_v47 = vld [vmem:[%s1352_s10] sm:$0xff]  ;;  %v1377_v48 = vld [vmem:[%s1352_s10 + $0x8] sm:$0xff]  ;;  %v316_v59 = vld [vmem:[%s1633_s1 + $0x150] sm:$0xff]  ;;  %v1056_v61 = vpack.c.bf16 %v285_v54, %v284_v53  ;;  %v1058_v62 = vpack.c.bf16 %v303_v57, %v302_v56 }
  0x13   : > { %1047 = vmatprep.subr.bf16.mxu0 %v1046_v30  ;;  %v257_v50 = vrot.slane %v1374_v47, 1  ;;  %v258_v51 = vrot.slane %v1377_v48, 1  ;;  %v317_v60 = vld [vmem:[%s1633_s1 + $0x158] sm:$0xff]  ;;  %v286_v63 = vld [vmem:[%s1633_s1 + $0x60] sm:$0xff]  ;;  %v287_v0 = vld [vmem:[%s1633_s1 + $0x68] sm:$0xff]  ;;  %v266_v26 = vrot.slane %v1374_v47, 2 }
  0x14   : > { %1074 = vmatpush3.bf16.msra.mxu1 %v1073_v33  ;;  %v1082_v1 = vpack.c.bf16 %v317_v60, %v316_v59  ;;  %v304_v2 = vld [vmem:[%s1633_s1 + $0xf0] sm:$0xff]  ;;  %v305_v3 = vld [vmem:[%s1633_s1 + $0xf8] sm:$0xff]  ;;  %v318_v4 = vld [vmem:[%s1633_s1 + $0x160] sm:$0xff]  ;;  %v1060_v6 = vpack.c.bf16 %v287_v0, %v286_v63  ;;  %v267_v27 = vrot.slane %v1377_v48, 2 }
  0x15   : > { %1075 = vmatprep.subr.bf16.mxu1 %v1206_v7  ;;  %v259_v58 = vsel %vm256_vm1, %v257_v50, %v258_v51  ;;  %v319_v5 = vld [vmem:[%s1633_s1 + $0x168] sm:$0xff]  ;;  %v1062_v8 = vpack.c.bf16 %v305_v3, %v304_v2  ;;  %v288_v9 = vld [vmem:[%s1633_s1 + $0x70] sm:$0xff]  ;;  %v289_v10 = vld [vmem:[%s1633_s1 + $0x78] sm:$0xff] }
  0x16   : > { %1049 = vmatpush3.bf16.msra.mxu0 %v1048_v38  ;;  %393 = vmatprep.mubr.f32.mxu0 %v259_v58  ;;  %v1085_v11 = vpack.c.bf16 %v319_v5, %v318_v4  ;;  %v1429_v12 = vld [vmem:[%s1352_s10 + $0x10] sm:$0xff]  ;;  %v552_v14 = vld [vmem:[%s1635_s3 + $0x80] sm:$0xff]  ;;  %v553_v15 = vld [vmem:[%s1635_s3 + $0x88] sm:$0xff]  ;;  %v1064_v18 = vpack.c.bf16 %v289_v10, %v288_v9  ;;  %v1482_v37 = vsel %vm265_vm2, %v266_v26, %v267_v27 }
  0x17   : > { %1051 = vmatprep.subr.bf16.mxu0 %v1050_v39  ;;  %v320_v16 = vld [vmem:[%s1633_s1 + $0x170] sm:$0xff]  ;;  %v321_v17 = vld [vmem:[%s1633_s1 + $0x178] sm:$0xff]  ;;  %v568_v19 = vld [vmem:[%s1635_s3 + $0x100] sm:$0xff]  ;;  %v260_v21 = vrot.slane %v1429_v12, 1  ;;  %v1090_v22 = vpack.c.bf16 %v553_v15, %v552_v14  ;;  %v269_v38 = vrot.slane %v1429_v12, 2 }
  0x18   : > { %1077 = vmatpush3.bf16.msra.mxu1 %v1076_v42  ;;  %v569_v20 = vld [vmem:[%s1635_s3 + $0x108] sm:$0xff]  ;;  %v536_v23 = vld [vmem:[%s1635_s3] sm:$0xff]  ;;  %v1088_v25 = vpack.c.bf16 %v321_v17, %v320_v16  ;;  %v554_v28 = vld [vmem:[%s1635_s3 + $0x90] sm:$0xff] }
  0x19   : > { %1078 = vmatprep.subr.bf16.mxu1 %v1206_v7  ;;  %v537_v24 = vld [vmem:[%s1635_s3 + $0x8] sm:$0xff]  ;;  %v555_v29 = vld [vmem:[%s1635_s3 + $0x98] sm:$0xff]  ;;  %v1122_v30 = vpack.c.bf16 %v569_v20, %v568_v19  ;;  %v570_v32 = vld [vmem:[%s1635_s3 + $0x110] sm:$0xff]  ;;  %v261_v34 = vsel %vm256_vm1, %v258_v51, %v260_v21 }
  0x1a   : > { %1053 = vmatpush3.bf16.msra.mxu0 %v1052_v49  ;;  %v1092_v31 = vpack.c.bf16 %v537_v24, %v536_v23  ;;  %v571_v33 = vld [vmem:[%s1635_s3 + $0x118] sm:$0xff]  ;;  %v1094_v35 = vpack.c.bf16 %v555_v29, %v554_v28  ;;  %v556_v39 = vld [vmem:[%s1635_s3 + $0xa0] sm:$0xff]  ;;  %v557_v40 = vld [vmem:[%s1635_s3 + $0xa8] sm:$0xff]  ;;  %v1508_v49 = vsel %vm265_vm2, %v267_v27, %v269_v38 }
  0x1b   : > { %1055 = vmatprep.subr.bf16.mxu0 %v1054_v52  ;;  %v539_v36 = vld [vmem:[%s1635_s3 + $0x18] sm:$0xff]  ;;  %v1126_v41 = vpack.c.bf16 %v571_v33, %v570_v32  ;;  %v572_v43 = vld [vmem:[%s1635_s3 + $0x120] sm:$0xff]  ;;  %v573_v44 = vld [vmem:[%s1635_s3 + $0x128] sm:$0xff]  ;;  %v1098_v45 = vpack.c.bf16 %v557_v40, %v556_v39  ;;  %v489_v33 = vlaneseq }
  0x1c   : > { %1080 = vmatpush3.bf16.msra.mxu1 %v1079_v55  ;;  %v540_v46 = vld [vmem:[%s1635_s3 + $0x20] sm:$0xff]  ;;  %v558_v50 = vld [vmem:[%s1635_s3 + $0xb0] sm:$0xff]  ;;  %v559_v51 = vld [vmem:[%s1635_s3 + $0xb8] sm:$0xff]  ;;  %v1130_v52 = vpack.c.bf16 %v573_v44, %v572_v43 }
  0x1d   : > { %1081 = vmatprep.subr.bf16.mxu1 %v1206_v7  ;;  %v1102_v54 = vpack.c.bf16 %v559_v51, %v558_v50  ;;  %v542_v55 = vld [vmem:[%s1635_s3 + $0x30] sm:$0xff]  ;;  %v543_v56 = vld [vmem:[%s1635_s3 + $0x38] sm:$0xff]  ;;  %v560_v57 = vld [vmem:[%s1635_s3 + $0xc0] sm:$0xff] }
  0x1e   : > { %1057 = vmatpush3.bf16.msra.mxu0 %v1056_v61  ;;  %v561_v58 = vld [vmem:[%s1635_s3 + $0xc8] sm:$0xff]  ;;  %v575_v60 = vld [vmem:[%s1635_s3 + $0x138] sm:$0xff]  ;;  %v544_v61 = vld [vmem:[%s1635_s3 + $0x40] sm:$0xff] }
  0x1f   : > { %1059 = vmatprep.subr.bf16.mxu0 %v1058_v62  ;;  %v1106_v59 = vpack.c.bf16 %v561_v58, %v560_v57  ;;  %v545_v62 = vld [vmem:[%s1635_s3 + $0x48] sm:$0xff]  ;;  %v563_v2 = vld [vmem:[%s1635_s3 + $0xd8] sm:$0xff]  ;;  %v576_v4 = vld [vmem:[%s1635_s3 + $0x140] sm:$0xff] }
  0x20   : > { %1083 = vmatpush3.bf16.msra.mxu1 %v1082_v1  ;;  %v1108_v0 = vpack.c.bf16 %v545_v62, %v544_v61  ;;  %v562_v1 = vld [vmem:[%s1635_s3 + $0xd0] sm:$0xff]  ;;  %v577_v5 = vld [vmem:[%s1635_s3 + $0x148] sm:$0xff]  ;;  %v547_v9 = vld [vmem:[%s1635_s3 + $0x58] sm:$0xff] }
  0x21   : > { %1084 = vmatprep.subr.bf16.mxu1 %v1206_v7  ;;  %v1110_v3 = vpack.c.bf16 %v563_v2, %v562_v1  ;;  %v578_v14 = vld [vmem:[%s1635_s3 + $0x150] sm:$0xff]  ;;  %v579_v16 = vld [vmem:[%s1635_s3 + $0x158] sm:$0xff]  ;;  %v548_v17 = vld [vmem:[%s1635_s3 + $0x60] sm:$0xff] }
  0x22   : > { %1061 = vmatpush3.bf16.msra.mxu0 %v1060_v6  ;;  %v546_v6 = vld [vmem:[%s1635_s3 + $0x50] sm:$0xff]  ;;  %v1142_v19 = vpack.c.bf16 %v579_v16, %v578_v14  ;;  %v580_v23 = vld [vmem:[%s1635_s3 + $0x160] sm:$0xff]  ;;  %v551_v27 = vld [vmem:[%s1635_s3 + $0x78] sm:$0xff] }
  0x23   : > { %1063 = vmatprep.subr.bf16.mxu0 %v1062_v8  ;;  %v1138_v8 = vpack.c.bf16 %v577_v5, %v576_v4  ;;  %v1112_v10 = vpack.c.bf16 %v547_v9, %v546_v6  ;;  %v550_v26 = vld [vmem:[%s1635_s3 + $0x70] sm:$0xff] }
  0x24   : > { %1086 = vmatpush3.bf16.msra.mxu1 %v1085_v11  ;;  %v564_v11 = vld [vmem:[%s1635_s3 + $0xe0] sm:$0xff]  ;;  %v1120_v29 = vpack.c.bf16 %v551_v27, %v550_v26 }
  0x25   : > { %1087 = vmatprep.subr.bf16.mxu1 %v1206_v7  ;;  %v538_v7 = vld [vmem:[%s1635_s3 + $0x10] sm:$0xff] }
  0x26   : > { %1065 = vmatpush3.bf16.msra.mxu0 %v1064_v18  ;;  %v1096_v42 = vpack.c.bf16 %v539_v36, %v538_v7  ;;  %v549_v18 = vld [vmem:[%s1635_s3 + $0x68] sm:$0xff]  ;;  %v836_v36 = vld [vmem:[%s1634_s2] ss:$0 sm:$0xff] }
  0x27   : > { %1091 = vmatprep.subr.bf16.mxu0 %v1090_v22  ;;  %v1116_v20 = vpack.c.bf16 %v549_v18, %v548_v17  ;;  %v567_v22 = vld [vmem:[%s1635_s3 + $0xf8] sm:$0xff] }
  0x28   : > { %1089 = vmatpush3.bf16.msra.mxu1 %v1088_v25  ;;  %v581_v25 = vld [vmem:[%s1635_s3 + $0x168] sm:$0xff] }
  0x29   : > { %394 = vmatmul.mubr.f32.vlgmr.msra.gmra.mrb[0].mxu0 %v1374_v47  ;;  %1123 = vmatprep.subr.bf16.mxu1 %v1122_v30  ;;  %v541_v47 = vld [vmem:[%s1635_s3 + $0x28] sm:$0xff]  ;;  %v1146_v28 = vpack.c.bf16 %v581_v25, %v580_v23 }
  0x2a   : > { %398 = vmatprep.mubr.f32.mxu0 %v261_v34  ;;  %1093 = vmatpush3.bf16.msra.mxu0 %v1092_v31  ;;  %v1100_v53 = vpack.c.bf16 %v541_v47, %v540_v46  ;;  %v583_v31 = vld [vmem:[%s1635_s3 + $0x178] sm:$0xff]  ;;  %v490_v34 = vshrl.u32 %v489_v33, 7 }
  0x2b   : > { %991 = vmatmul.mubr.f32.vlgmr.msra.gmra.mrb[0].mxu1 %v1482_v37  ;;  %1095 = vmatprep.subr.bf16.mxu0 %v1094_v35 }
  0x2c   : > { %993 = vmatprep.mubr.msk.f32.mxu1 %vm1207_vm0, %v1208_v13  ;;  %1125 = vmatpush3.bf16.msra.mxu1 %v1122_v30  ;;  %v582_v30 = vld [vmem:[%s1635_s3 + $0x170] sm:$0xff]  ;;  %v495_v40 = vadd.s32 4294967295, %v490_v34  ;;  %v492_v51 = vadd.s32 16, %v490_v34 }
  0x2d   : > { %399 = vmatmul.mubr.f32.gmra.mrb[2].mxu0 %v1377_v48  ;;  %1127 = vmatprep.subr.bf16.mxu1 %v1126_v41  ;;  %v1104_v48 = vpack.c.bf16 %v543_v56, %v542_v55  ;;  %v1150_v32 = vpack.c.bf16 %v583_v31, %v582_v30 }
  0x2e   : > { %403 = vmatprep.mubr.f32.mxu0 %v260_v21  ;;  %1097 = vmatpush3.bf16.msra.mxu0 %v1096_v42  ;;  %v566_v21 = vld [vmem:[%s1635_s3 + $0xf0] sm:$0xff]  ;;  %vm498_vm3 = vcmp.ge.s32.totalorder %v495_v40, 0 }
  0x2f   : > { %994 = vmatmul.mubr.f32.gmra.mrb[2].mxu1 %v1508_v49  ;;  %1099 = vmatprep.subr.bf16.mxu0 %v1098_v45  ;;  %v1118_v24 = vpack.c.bf16 %v567_v22, %v566_v21 }
  0x30   : > { %996 = vmatprep.mubr.msk.f32.mxu1 %vm1207_vm0, %v1208_v13  ;;  %1129 = vmatpush3.bf16.msra.mxu1 %v1126_v41  ;;  %v574_v13 = vld [vmem:[%s1635_s3 + $0x130] sm:$0xff] }
  0x31   : > { %404 = vmatmul.mubr.f32.gmra.mrb[4].mxu0 %v1429_v12  ;;  %1131 = vmatprep.subr.bf16.mxu1 %v1130_v52  ;;  %v1134_v63 = vpack.c.bf16 %v575_v60, %v574_v13  ;;  %v565_v12 = vld [vmem:[%s1635_s3 + $0xe8] sm:$0xff]  ;;  %v497_v13 = vadd.s32 4294967295, %v492_v51 }
  0x32   : > { %1101 = vmatpush3.bf16.msra.mxu0 %v1100_v53  ;;  %v1114_v15 = vpack.c.bf16 %v565_v12, %v564_v11 }
  0x33   : > { %997 = vmatmul.mubr.f32.gmra.mrb[4].mxu1 %v269_v38  ;;  %1103 = vmatprep.subr.bf16.mxu0 %v1102_v54  ;;  %vm503_vm4 = vcmp.lt.s32.totalorder %v497_v13, 16 }
  0x34   : > { %1133 = vmatpush3.bf16.msra.mxu1 %v1130_v52 }
  0x35   : > { %1135 = vmatprep.subr.bf16.mxu1 %v1134_v63 }
  0x36   : > { %1105 = vmatpush3.bf16.msra.mxu0 %v1104_v48 }
  0x37   : > { %1107 = vmatprep.subr.bf16.mxu0 %v1106_v59 }
  0x38   : > { %1137 = vmatpush3.bf16.msra.mxu1 %v1134_v63 }
  0x39   : > { %1139 = vmatprep.subr.bf16.mxu1 %v1138_v8 }
  0x3a   : > { %1109 = vmatpush3.bf16.msra.mxu0 %v1108_v0 }
  0x3b   : > { %1111 = vmatprep.subr.bf16.mxu0 %v1110_v3 }
  0x3c   : > { %1141 = vmatpush3.bf16.msra.mxu1 %v1138_v8 }
  0x3d   : > { %1143 = vmatprep.subr.bf16.mxu1 %v1142_v19 }
  0x3e   : > { %1113 = vmatpush3.bf16.msra.mxu0 %v1112_v10 }
  0x3f   : > { %1115 = vmatprep.subr.bf16.mxu0 %v1114_v15  ;;  %v837_v15 = vld [vmem:[%s1636_s4] ss:$0 sm:$0xff] }
  0x40   : > { %1145 = vmatpush3.bf16.msra.mxu1 %v1142_v19 }
  0x41   : > { %1147 = vmatprep.subr.bf16.mxu1 %v1146_v28 }
  0x42   : > { %1117 = vmatpush3.bf16.msra.mxu0 %v1116_v20 }
  0x43   : > { %1119 = vmatprep.subr.bf16.mxu0 %v1118_v24 }
  0x44   : > { %1149 = vmatpush3.bf16.msra.mxu1 %v1146_v28 }
  0x45   : > { %1151 = vmatprep.subr.bf16.mxu1 %v1150_v32 }
  0x46   : > { %1121 = vmatpush3.bf16.msra.mxu0 %v1120_v29 }
  0x48   : > { %1153 = vmatpush3.bf16.msra.mxu1 %v1150_v32 }
  0xfc   : > { %v874_v35 = vpop.f32.mrb[0].mxu0 }
  0xfd   : > { %v875_v7 = vpop.f32.mrb[1].mxu0 }
  0xfe   : > { %v876_v38 = vadd.f32 %v875_v7, %v874_v35  ;;  %v475_v39 = vpop.f32.mrb[0].mxu1 }
  0xff   : > { %v992_v41 = vpop.f32.mrb[1].mxu1 }
 0x100   : > { %v877_v42 = vpop.f32.mrb[2].mxu0  ;;  %v396_v43 = vadd.f32 %v876_v38, %v836_v36 }
 0x101   : > { %v878_v44 = vpop.f32.mrb[3].mxu0 }
 0x102   : > { %v476_v45 = vadd.f32 %v475_v39, %v396_v43  ;;  %v879_v46 = vadd.f32 %v878_v44, %v877_v42  ;;  %v480_v47 = vpop.f32.mrb[2].mxu1 }
 0x103   : > { %v995_v50 = vpop.f32.mrb[3].mxu1 }
 0x104   : > { %v507_v52 = vmax.f32 %v476_v45, 0.0  ;;  %v880_v53 = vpop.f32.mrb[4].mxu0  ;;  %v401_v54 = vadd.f32 %v879_v46, %v836_v36 }
 0x105   : > { %v881_v55 = vpop.f32.mrb[5].mxu0 }
 0x106   : > { %v516_v56 = vsel %vm498_vm3, %v507_v52, 0.0  ;;  %v481_v48 = vadd.f32 %v480_v47, %v401_v54  ;;  %v882_v57 = vadd.f32 %v881_v55, %v880_v53  ;;  %v485_v58 = vpop.f32.mrb[4].mxu1 }
 0x107   : > { %v998_v59 = vpop.f32.mrb[5].mxu1  ;;  %v522_v62 = vrot.slane %v516_v56, 1  ;;  %v529_v63 = vrot.slane %v516_v56, 2 }
 0x108   : > { %v508_v60 = vmax.f32 %v481_v48, 0.0  ;;  %v406_v61 = vadd.f32 %v882_v57, %v836_v36 }
 0x10a   : > { %v523_v0 = vrot.slane %v508_v60, 1  ;;  %v530_v1 = vrot.slane %v508_v60, 2  ;;  %v486_v2 = vadd.f32 %v485_v58, %v406_v61 }
 0x10c   : > { %v509_v3 = vmax.f32 %v486_v2, 0.0  ;;  %v524_v4 = vsel %vm256_vm1, %v522_v62, %v523_v0  ;;  %v531_v5 = vsel %vm265_vm2, %v529_v63, %v530_v1 }
 0x10d   : > { %655 = vmatprep.mubr.f32.mxu0 %v524_v4  ;;  %1031 = vmatprep.mubr.f32.mxu1 %v531_v5 }
 0x10e   : > { %v518_v6 = vsel %vm503_vm4, %v509_v3, 0.0  ;;  %838 = vmatmul.mubr.msk.f32.vlgmr.msra.gmra.mrb[6].mxu0 %vm498_vm3, %v507_v52 }
 0x10f   : > { %v525_v8 = vrot.slane %v518_v6, 1  ;;  %v532_v9 = vrot.slane %v518_v6, 2 }
 0x111   : > { %v526_v10 = vsel %vm256_vm1, %v523_v0, %v525_v8  ;;  %v533_v11 = vsel %vm265_vm2, %v530_v1, %v532_v9 }
 0x112   : > { %660 = vmatprep.mubr.f32.mxu0 %v526_v10  ;;  %1032 = vmatmul.mubr.f32.vlgmr.msra.gmra.mrb[6].mxu1 %v533_v11 }
 0x113   : > { %661 = vmatmul.mubr.f32.gmra.mrb[8].mxu0 %v508_v60 }
 0x1e1   : > { %v934_v12 = vpop.f32.mrb[6].mxu0 }
 0x1e2   : > { %v935_v14 = vpop.f32.mrb[7].mxu0 }
 0x1e3   : > { %v936_v16 = vadd.f32 %v935_v14, %v934_v12 }
 0x1e5   : > { %v1033_v17 = vpop.f32.mrb[6].mxu1  ;;  %v658_v18 = vadd.f32 %v936_v16, %v837_v15 }
 0x1e6   : > { %v937_v19 = vpop.f32.mrb[8].mxu0  ;;  %v732_v20 = vpop.f32.mrb[7].mxu1 }
 0x1e7   : > { %v733_v21 = vadd.f32 %v732_v20, %v658_v18  ;;  %v938_v22 = vpop.f32.mrb[9].mxu0 }
 0x1e8   : > { %v939_v23 = vadd.f32 %v938_v22, %v937_v19 }
 0x1e9   : > { %v741_v24 = vadd.f32 %v733_v21, %v1482_v37 }
 0x1ea   : > { %v663_v25 = vadd.f32 %v939_v23, %v837_v15 }
 0x1eb   : > { %743 = vst [vmem:[%s246_s13] sm:$0xff] %v741_v24 }
 0x1ec   : > { %v738_v26 = vadd.f32 %v1033_v17, %v663_v25 }
 0x1ee   : > { %v742_v27 = vadd.f32 %v738_v26, %v1508_v49 }
 0x1f0   : > { %744 = vst [vmem:[%s246_s13 + $0x8] sm:$0xff] %v742_v27 }
 0x1f1 PF: > { %s15_s20 = sadd.s32 1, %s1204_s20   ;;  %s1638_s18 = smov %s1200_s19 }
 0x1f2   : > { %p12_p5 = scmp.ge.s32.totalorder %s15_s20, 4   ;;  %s1639_s19 = smov %s1641_s21 }
 0x1f4   :  { %14 = sbr.rel (!%p12_p5) target bundleno = 2 (0x2), region = 71 }

</bundles_post_ra>
